<compile_context>
chip_gen: v6e
topology: v6e:2x2x1
jax: 0.10.0
libtpu: 0.0.40
codegen_flags: <defaults>
</compile_context>

<pallas_src>
import jax
import jax.numpy as jnp
from jax.experimental import pallas as pl
from jax.experimental.pallas import tpu as pltpu

_TARGET_TILE_BYTES = 2 * 1024 * 1024  # ~2 MiB per input tile (8 MiB pipelined w/ out)


def _copy_kernel(x_ref, o_ref):
    # Whole-tile copy: the empty Sequential is the identity function.
    o_ref[...] = x_ref[...]


def knnlc_forward(x):
    """KNNLC.forward — the module's Sequential is empty, so this is exactly identity.

    Best implementation (per perf review): do not emit a pallas_call at all.
    """
    return x


def knnlc_forward_copy(x):
    """Identity that materializes a NEW output buffer via a Pallas copy.

    Only use this if a distinct HBM buffer is actually required; otherwise prefer
    `knnlc_forward`, which is free.  (If no compute will ever be fused here, a plain
    XLA copy is also equivalent — this kernel exists as the fusion point.)
    """
    orig_shape = x.shape
    dtype = x.dtype
    n = int(x.size)
    itemsize = jnp.dtype(dtype).itemsize

    # View as (rows, D) on the native layout: collapse leading dims, keep last dim.
    if x.ndim >= 2:
        d = orig_shape[-1]
        rows = n // d
    else:
        d = n
        rows = 1
    x2d = x.reshape(rows, d)

    # Row tile: whole array when small; otherwise a multiple-of-8 row count whose
    # f32/bf16 tile lands around _TARGET_TILE_BYTES.
    cap_rows = max(8, (_TARGET_TILE_BYTES // max(1, d * itemsize)) // 8 * 8)
    if rows <= cap_rows:
        tb = rows              # single whole-array block; grid = (1,)
    else:
        tb = cap_rows          # multiple of 8; edge block masked automatically
    grid = (pl.cdiv(rows, tb),)

    out2d = pl.pallas_call(
        _copy_kernel,
        out_shape=jax.ShapeDtypeStruct((rows, d), dtype),
        grid_spec=pltpu.PrefetchScalarGridSpec(
            num_scalar_prefetch=0,
            grid=grid,
            in_specs=[pl.BlockSpec((tb, d), lambda i: (i, 0))],
            out_specs=pl.BlockSpec((tb, d), lambda i: (i, 0)),
        ),
        compiler_params=pltpu.CompilerParams(
            # "parallel" lets v7x's 2 TensorCores each stream part of the grid when
            # there is more than one step; harmless no-op on v5e/v6e (1 TC).
            dimension_semantics=("parallel",),
        ),
        cost_estimate=pl.CostEstimate(
            flops=0,
            transcendentals=0,
            bytes_accessed=2 * n * itemsize,  # actual traffic, not padded
        ),
    )(x2d)

    return out2d.reshape(orig_shape)


if __name__ == "__main__":
    key = jax.random.PRNGKey(0)
    # Module-consistent shape: batch=2 feature vectors of length input_node=2723.
    x = jax.random.normal(key, (2, 2723), dtype=jnp.float32)

    # Primary path: identity without any kernel launch (what the module actually does).
    y_fast = knnlc_forward(x)

    # Pallas copy path (exercised once; used only when a fresh buffer is required).
    y_copy = jax.block_until_ready(knnlc_forward_copy(x))

    assert y_fast.shape == x.shape and y_fast.dtype == x.dtype
    assert y_copy.shape == x.shape and y_copy.dtype == x.dtype
    assert bool(jnp.array_equal(y_fast, x))
    assert bool(jnp.array_equal(y_copy, x))

    print("KERNEL_OK")
</pallas_src>

<mosaic_0001>
module attributes {stable_mosaic.version = 11 : i64} {
  func.func @_copy_kernel(%arg0: i32, %arg1: memref<2x2723xf32, #tpu.memory_space<vmem>>, %arg2: memref<2x2723xf32, #tpu.memory_space<vmem>>) attributes {dimension_semantics = [#tpu.dimension_semantics<parallel>], iteration_bounds = array<i64: 1>, scalar_prefetch = 0 : i64, scratch_operands = 0 : i64, tpu.core_type = #tpu.core_type<tc>, window_params = [{transform_indices = @transform_0, window_bounds = array<i64: 2, 2723>}, {transform_indices = @transform_1, window_bounds = array<i64: 2, 2723>}]} {
    %c0 = arith.constant 0 : index
    %c0_0 = arith.constant 0 : index
    %0 = vector.load %arg1[%c0, %c0_0] : memref<2x2723xf32, #tpu.memory_space<vmem>>, vector<2x2723xf32>
    %c0_1 = arith.constant 0 : index
    %c0_2 = arith.constant 0 : index
    %1 = vector.load %arg2[%c0_1, %c0_2] : memref<2x2723xf32, #tpu.memory_space<vmem>>, vector<2x2723xf32>
    tpu.vector_store %arg2[%c0_1, %c0_2], %0 {strides = array<i32>} : memref<2x2723xf32, #tpu.memory_space<vmem>>, vector<2x2723xf32>,
    return
  }
  func.func @transform_0(%arg0: i32) -> (i32, i32) {
    %c0_i32 = arith.constant 0 : i32
    %c0_i32_0 = arith.constant 0 : i32
    return %arg0, %c0_i32 : i32, i32
  }
  func.func @transform_1(%arg0: i32) -> (i32, i32) {
    %c0_i32 = arith.constant 0 : i32
    %c0_i32_0 = arith.constant 0 : i32
    return %arg0, %c0_i32 : i32, i32
  }
}

</mosaic_0001>

<bundles_post_ra>
// kernel: tpu_custom_call.1
= control target key start
LH: loop header
LB: loop body
LE: loop exit
PB: predicated region body
PF: predicated region fallthrough
CT: control target
= control target key end

     0   :  { %6 = vsyncpa [#allocation3], 0  ;;  %s115_s0 = inlined_call_operand.hbm [shape: f32[2,2723], index: 0, kind: input, shape index: {}]   ;;  %s116_s1 = inlined_call_operand.hbm [shape: f32[2,2723], index: 1, kind: output, shape index: {}]  }
   0x1   :  { %7 = vsyncpa [#allocation4], 0  ;;  %s97_s6 = smov [#allocation2]  }
   0x2   :  { %s14_s7 = sshll.u32 %s97_s6, 4  ;;  %s15_s7 = int_to_ptr.vmem [resolvable:$true] %s14_s7 }
   0x3   :  { %s61_s8 = scalar_lea.vmem %s15_s7, 704  ;;  %p66_p1 = scmp.lt.s32.totalorder %s15_s7, %s15_s7 }
   0x4   :  { %p62_p0 = scmp.ne.s32.totalorder %s15_s7, %s61_s8  ;;  %p67_p2 = scmp.lt.s32.totalorder %s61_s8, %s61_s8 }
   0x6   :  { %p68_p3 = por %p67_p2, %p66_p1 }
   0x8   :  { %p69_p4 = pnand %p68_p3, %p62_p0 }
   0xa   :  { %72 = shalt.err (!%p69_p4)
}
   0xb   :  { %17 = dma.hbm_to_vmem [thread:$0]  %s115_s0, 704, %s15_s7, [#allocation3]  }
   0xc   :  { %93 = dma.done.wait [#allocation3], 704  }
   0xd   :  { %94 = vsyncadd [#allocation3], 4294966592  ;;  %vm32_vm0 = vcmask 1041408   ;;  %vm33_vm1 = vcmask 281602   ;;  %s98_s11 = smov [#allocation5]   ;;  %v21_v0 = vld [vmem:[#allocation2] sm:$0xff] }
   0xe   :  { %s42_s12 = sshll.u32 %s98_s11, 4  ;;  %vm34_vm2 = vmor %vm33_vm1, %vm32_vm0  ;;  %v22_v1 = vld [vmem:[#allocation2 + $0x8] sm:$0xff]  ;;  %v23_v2 = vld [vmem:[#allocation2 + $0x10] sm:$0xff]  ;;  %27 = vst [vmem:[#allocation5] sm:$0xff] %v21_v0  ;;  %s43_s12 = int_to_ptr.vmem [resolvable:$true] %s42_s12 }
   0xf   :  { %28 = vst [vmem:[#allocation5 + $0x8] sm:$0xff] %v22_v1  ;;  %29 = vst [vmem:[#allocation5 + $0x10] sm:$0xff] %v23_v2  ;;  %v24_v3 = vld [vmem:[#allocation2 + $0x18] sm:$0xff]  ;;  %v25_v4 = vld [vmem:[#allocation2 + $0x20] sm:$0xff]  ;;  %s73_s0 = scalar_lea.vmem %s43_s12, 704  ;;  %p78_p6 = scmp.lt.s32.totalorder %s43_s12, %s43_s12 }
  0x10   :  { %v26_v5 = vld [vmem:[#allocation2 + $0x28] sm:$0xf]  ;;  %30 = vst [vmem:[#allocation5 + $0x18] sm:$0xff] %v24_v3  ;;  %31 = vst [vmem:[#allocation5 + $0x20] sm:$0xff] %v25_v4  ;;  %p74_p5 = scmp.ne.s32.totalorder %s43_s12, %s73_s0  ;;  %p79_p7 = scmp.lt.s32.totalorder %s73_s0, %s73_s0 }
  0x11   :  { %35 = vst.msk [vmem:[#allocation5 + $0x28] sm:$0xf] %vm34_vm2, %v26_v5 }
  0x12   :  { %p80_p8 = por %p79_p7, %p78_p6 }
  0x14   :  { %p81_p9 = pnand %p80_p8, %p74_p5 }
  0x16   :  { %84 = shalt.err (!%p81_p9)
}
  0x17   :  { %45 = dma.vmem_to_hbm [thread:$0]  %s43_s12, 704, %s116_s1, [#allocation4]  }
  0x18   :  { %95 = dma.done.wait [#allocation4], 704  }
  0x19   :  { %96 = vsyncadd [#allocation4], 4294966592 }
  0x1a   :  { %49 = vsyncpa [#allocation3], 1 }
  0x1b   :  { %50 = vsyncpa [#allocation4], 1 }

</bundles_post_ra>
